<compile_context>
chip_gen: v6e
topology: v6e:2x2x1
jax: 0.10.0
libtpu: 0.0.40
codegen_flags: <defaults>
</compile_context>

<pallas_src>
import functools

import jax
import jax.numpy as jnp
from jax.experimental import pallas as pl
from jax.experimental.pallas import tpu as pltpu


def _class_proto_kernel(n_shot, d, s_ref, o_ref):
    """Half-split support mean, batched over a block of classes.

    s_ref: [n_support, BLK, D]  (support rows lead; classes -> sublanes; D -> lanes)
    o_ref: [BLK, 2*D]           (o[:, :D] = pos mean, o[:, D:] = neg mean)
    """
    inv = jnp.float32(1.0 / n_shot)  # hoisted scalar constant
    # Reduce over the leading (untiled) axis => VALU adds of [BLK, D] tiles.
    # Cast per-slice so only the rows being summed are materialized in f32.
    pos = jnp.sum(s_ref[pl.ds(0, n_shot)].astype(jnp.float32), axis=0) * inv
    neg = jnp.sum(s_ref[pl.ds(n_shot, n_shot)].astype(jnp.float32), axis=0) * inv
    o_ref[:, :d] = pos.astype(o_ref.dtype)
    o_ref[:, d:] = neg.astype(o_ref.dtype)


def _vmem_budget():
    """(per-input-block byte cap, vmem_limit_bytes or None) per TPU generation."""
    try:
        info = pltpu.get_tpu_info()
        vmem = int(getattr(info, "vmem_capacity_bytes", 0)) or (64 << 20)
    except Exception:
        vmem = 64 << 20                        # conservative: v7x per-TC VMEM
    if vmem >= (100 << 20):                    # v5e / v6e: 128 MiB physical
        return 14 << 20, 64 << 20              # big blocks, raise scoped limit
    # v7x-class (64 MiB physical / 32 MiB scoped default): keep 2x double-
    # buffered input blocks comfortably inside the default scoped limit.
    return 6 << 20, None


def _pick_block_classes(n_classes, n_support, d, itemsize, cap_bytes):
    """Largest sublane-aligned class block under the per-block byte cap."""
    sub = {1: 32, 2: 16}.get(itemsize, 8)      # sublane packing per dtype
    bytes_per_class = max(1, n_support * d * itemsize)
    blk = max(1, cap_bytes // bytes_per_class)
    blk = min(blk, n_classes)
    # Give the grid >= 2 steps when the class count allows it, so the
    # "parallel" class axis actually feeds both TensorCores on v7x.
    if blk >= n_classes and n_classes >= 2 * sub:
        blk = pl.cdiv(n_classes, 2)
    if blk < n_classes:
        # A partial-extent block must be sublane aligned; full extent need not.
        blk = max(sub, (blk // sub) * sub)
        if blk >= n_classes:
            blk = n_classes
    return blk


@functools.partial(jax.jit, static_argnums=(1, 2, 3))
def _batched_class_proto(s_all, n_shot, block_classes, vmem_limit_bytes):
    """s_all: [n_support, C, D] -> [C, 2*D] (pos ++ neg half-means per class)."""
    n_support, c, d = s_all.shape
    kernel = functools.partial(_class_proto_kernel, n_shot, d)
    return pl.pallas_call(
        kernel,
        out_shape=jax.ShapeDtypeStruct((c, 2 * d), s_all.dtype),
        grid=(pl.cdiv(c, block_classes),),       # ragged last block masked by Pallas
        in_specs=[
            pl.BlockSpec((n_support, block_classes, d), lambda i: (0, i, 0)),
        ],
        out_specs=pl.BlockSpec((block_classes, 2 * d), lambda i: (i, 0)),
        compiler_params=pltpu.CompilerParams(
            dimension_semantics=("parallel",),
            vmem_limit_bytes=vmem_limit_bytes,
        ),
    )(s_all)


def class_proto_batched(s_all):
    """Batched ClassProto.forward; s_all stacked as [n_support, C, D] -> [C, 2*D]."""
    n_support, c, d = s_all.shape
    n_shot = int(n_support // 2)
    if n_shot == 0:
        # Reference would take the mean of an empty slice (div by zero); guard.
        raise ValueError("ClassProto requires n_support >= 2")
    cap_bytes, vmem_limit = _vmem_budget()
    block_classes = _pick_block_classes(c, n_support, d, s_all.dtype.itemsize,
                                        cap_bytes)
    return _batched_class_proto(s_all, n_shot, block_classes, vmem_limit)


class TargetEmb:
    """Python-side glue replicating TargetEmb -> TargetPool -> ClassProto."""

    def __init__(self, test_dataset="test_ds"):
        self.test_dataset = test_dataset
        # args.map_pre_fc = False => ClassProto holds no parameters.

    def _encode_task_with_index(self, dataset_dict):
        cls_index = {}
        idx = 0
        for k in dataset_dict:
            cls = dataset_dict[k]
            for c in range(len(cls)):
                cls_index[(k, c)] = idx
                idx += 1
        return cls_index

    def __call__(self, supemb, dataset_dict):
        if not isinstance(dataset_dict, dict):
            dataset_dict = {self.test_dataset: dataset_dict}
        cls_index = self._encode_task_with_index(dataset_dict)

        # Group present keys by (n_support, D, dtype): one stacked tensor and
        # one pallas_call (one compile) per distinct shape/dtype.
        groups = {}
        for key in cls_index:
            if key not in supemb:
                print('no key in support embeddings')
                continue
            emb = supemb[key]
            if isinstance(emb, dict):
                emb = emb['s_data']
            emb = jnp.asarray(emb)
            gkey = (emb.shape[0], emb.shape[1], str(emb.dtype))
            groups.setdefault(gkey, []).append((key, emb))

        targetpool = {}
        for (_, _, _), items in groups.items():
            keys = [k for k, _ in items]
            # Stack with n_support leading -> [n_support, C, D]; the kernel
            # reduces over this leading axis with plain VALU adds.
            embs = jnp.stack([e for _, e in items], axis=1)
            out = class_proto_batched(embs)                  # [C, 2*D]
            # NOTE: for large C, consume `out` directly instead of this
            # per-key device-slice unstack (host-side glue dominates there).
            for i, k in enumerate(keys):
                targetpool[k] = out[i:i + 1]                 # [1, 2*D]
        return targetpool


def _reference_class_proto(s_emb):
    n_support = s_emb.shape[0]
    n_shot = n_support // 2
    pos = jnp.mean(s_emb[:n_shot], axis=0, keepdims=True)
    neg = jnp.mean(s_emb[n_shot:2 * n_shot], axis=0, keepdims=True)
    return jnp.concatenate([pos, neg], axis=-1)


if __name__ == "__main__":
    key = jax.random.PRNGKey(0)
    n_support = 8      # support set size per class
    map_dim = 32       # feature dim (args.map_dim)
    n_classes = 3

    # dataset_dict is NOT a dict -> exercises the wrapping branch in forward()
    dataset_names = ["clsA", "clsB", "clsC"][:n_classes]
    test_dataset = "tox21"

    supemb = {}
    for c in range(n_classes):
        key, sub = jax.random.split(key)
        emb = jax.random.normal(sub, (n_support, map_dim), dtype=jnp.float32)
        if c == 1:
            # exercise the {'s_data': ...} dict branch
            supemb[(test_dataset, c)] = {"s_data": emb}
        else:
            supemb[(test_dataset, c)] = emb

    model = TargetEmb(test_dataset=test_dataset)
    out = model(supemb, dataset_names)

    # Block and verify against a pure-JAX reference.
    ok = True
    for k, v in out.items():
        v = jax.block_until_ready(v)
        emb = supemb[k]
        if isinstance(emb, dict):
            emb = emb["s_data"]
        ref = _reference_class_proto(emb)
        assert v.shape == (1, 2 * map_dim), v.shape
        ok &= bool(jnp.allclose(v, ref, atol=1e-5, rtol=1e-5))

    if ok:
        print("KERNEL_OK")
</pallas_src>

<mosaic_0001>
module attributes {stable_mosaic.version = 11 : i64} {
  func.func @_class_proto_kernel(%arg0: i32, %arg1: memref<8x3x32xf32, #tpu.memory_space<vmem>>, %arg2: memref<3x64xf32, #tpu.memory_space<vmem>>) attributes {dimension_semantics = [#tpu.dimension_semantics<parallel>], iteration_bounds = array<i64: 1>, scalar_prefetch = 0 : i64, scratch_operands = 0 : i64, tpu.core_type = #tpu.core_type<tc>, window_params = [{transform_indices = @transform_0, window_bounds = array<i64: 8, 3, 32>}, {transform_indices = @transform_1, window_bounds = array<i64: 3, 64>}]} {
    %c0 = arith.constant 0 : index
    %c0_0 = arith.constant 0 : index
    %c0_1 = arith.constant 0 : index
    %0 = vector.load %arg1[%c0, %c0_0, %c0_1] : memref<8x3x32xf32, #tpu.memory_space<vmem>>, vector<4x3x32xf32>
    %cst = arith.constant dense<0.000000e+00> : vector<3x32xf32>
    %1 = vector.multi_reduction <add>, %0, %cst [0] : vector<4x3x32xf32> to vector<3x32xf32>
    %cst_2 = arith.constant 2.500000e-01 : f32
    %2 = vector.broadcast %cst_2 : f32 to vector<3x32xf32>
    %3 = arith.mulf %1, %2 : vector<3x32xf32>
    %c4 = arith.constant 4 : index
    %c0_3 = arith.constant 0 : index
    %c0_4 = arith.constant 0 : index
    %4 = vector.load %arg1[%c4, %c0_3, %c0_4] : memref<8x3x32xf32, #tpu.memory_space<vmem>>, vector<4x3x32xf32>
    %cst_5 = arith.constant dense<0.000000e+00> : vector<3x32xf32>
    %5 = vector.multi_reduction <add>, %4, %cst_5 [0] : vector<4x3x32xf32> to vector<3x32xf32>
    %cst_6 = arith.constant 2.500000e-01 : f32
    %6 = vector.broadcast %cst_6 : f32 to vector<3x32xf32>
    %7 = arith.mulf %5, %6 : vector<3x32xf32>
    %c0_7 = arith.constant 0 : index
    %c0_8 = arith.constant 0 : index
    %8 = vector.load %arg2[%c0_7, %c0_8] : memref<3x64xf32, #tpu.memory_space<vmem>>, vector<3x32xf32>
    tpu.vector_store %arg2[%c0_7, %c0_8], %3 {strides = array<i32>} : memref<3x64xf32, #tpu.memory_space<vmem>>, vector<3x32xf32>,
    %c0_9 = arith.constant 0 : index
    %c32 = arith.constant 32 : index
    %9 = vector.load %arg2[%c0_9, %c32] : memref<3x64xf32, #tpu.memory_space<vmem>>, vector<3x32xf32>
    tpu.vector_store %arg2[%c0_9, %c32], %7 {strides = array<i32>} : memref<3x64xf32, #tpu.memory_space<vmem>>, vector<3x32xf32>,
    return
  }
  func.func @transform_0(%arg0: i32) -> (i32, i32, i32) {
    %c0_i32 = arith.constant 0 : i32
    %c0_i32_0 = arith.constant 0 : i32
    %c0_i32_1 = arith.constant 0 : i32
    return %c0_i32, %arg0, %c0_i32_0 : i32, i32, i32
  }
  func.func @transform_1(%arg0: i32) -> (i32, i32) {
    %c0_i32 = arith.constant 0 : i32
    %c0_i32_0 = arith.constant 0 : i32
    return %arg0, %c0_i32 : i32, i32
  }
}

</mosaic_0001>

<bundles_post_ra>
// kernel: _batched_class_proto.1
= control target key start
LH: loop header
LB: loop body
LE: loop exit
PB: predicated region body
PF: predicated region fallthrough
CT: control target
= control target key end

     0   :  { %vm13_vm0 = vcmask 256000   ;;  %s132_s0 = inlined_call_operand.vmem [shape: f32[8,3,32], index: 0, kind: input, shape index: {}]   ;;  %s133_s1 = inlined_call_operand.hbm [shape: f32[3,64], index: 1, kind: output, shape index: {}]  }
   0x1   :  { %v56_v0 = vld [vmem:[%s132_s0 + $0x10] sm:$0x7]  ;;  %v57_v1 = vld [vmem:[%s132_s0 + $0x14] sm:$0x7]  ;;  %v58_v2 = vld [vmem:[%s132_s0 + $0x18] sm:$0x7] }
   0x2   :  { %v59_v3 = vld [vmem:[%s132_s0 + $0x1c] sm:$0x7]  ;;  %v27_v4 = vsel %vm13_vm0, %v56_v0, 0.0  ;;  %v28_v5 = vsel %vm13_vm0, %v57_v1, 0.0  ;;  %v30_v7 = vsel %vm13_vm0, %v58_v2, 0.0 }
   0x3   :  { %v29_v6 = vadd.f32 %v28_v5, %v27_v4  ;;  %v32_v8 = vsel %vm13_vm0, %v59_v3, 0.0 }
   0x4   :  { %6 = vsyncpa [#allocation3], 0  ;;  %v9_v9 = vld [vmem:[%s132_s0] sm:$0x7]  ;;  %v10_v10 = vld [vmem:[%s132_s0 + $0x4] sm:$0x7] }
   0x5   :  { %v11_v11 = vld [vmem:[%s132_s0 + $0x8] sm:$0x7]  ;;  %v12_v12 = vld [vmem:[%s132_s0 + $0xc] sm:$0x7]  ;;  %v31_v13 = vadd.f32 %v30_v7, %v29_v6  ;;  %v14_v14 = vsel %vm13_vm0, %v9_v9, 0.0  ;;  %v15_v15 = vsel %vm13_vm0, %v10_v10, 0.0 }
   0x6   :  { %v17_v16 = vsel %vm13_vm0, %v11_v11, 0.0  ;;  %v16_v17 = vadd.f32 %v15_v15, %v14_v14  ;;  %v19_v19 = vsel %vm13_vm0, %v12_v12, 0.0  ;;  %s84_s22 = smov 32   ;;  %s85_s0 = smov [#allocation2]   ;;  %vm40_vm1 = vcmask 518400  }
   0x7   :  { %v33_v18 = vadd.f32 %v32_v8, %v31_v13  ;;  %s48_s23 = sshll.u32 %s85_s0, 4  ;;  %s49_s23 = int_to_ptr.vmem [resolvable:$true] %s48_s23 }
   0x8   :  { %v18_v20 = vadd.f32 %v17_v16, %v16_v17  ;;  %s62_s24 = scalar_lea.vmem %s49_s23, 64  ;;  %p67_p1 = scmp.lt.s32.totalorder %s49_s23, %s49_s23 }
   0x9   :  { %v34_v21 = vmul.f32 0.25, %v33_v18  ;;  %p63_p0 = scmp.ne.s32.totalorder %s49_s23, %s62_s24  ;;  %p68_p2 = scmp.lt.s32.totalorder %s62_s24, %s62_s24 }
   0xa   :  { %v20_v22 = vadd.f32 %v19_v19, %v18_v20 }
   0xb   :  { %37 = vrot.lane.b32.xlu0 %v34_v21, %s84_s22  ;;  %p69_p3 = por %p68_p2, %p67_p1 }
   0xc   :  { %v21_v23 = vmul.f32 0.25, %v20_v22 }
   0xd   :  { %p70_p4 = pnand %p69_p3, %p63_p0 }
   0xe   :  { %35 = vst.msk [vmem:[#allocation2] sm:$0x7] %vm13_vm0, %v21_v23 }
  0x7d   :  { %v38_v24 = vpop.permute.xlu0 %37 }
  0x7e   :  { %41 = vst.msk [vmem:[#allocation2] sm:$0x7] %vm40_vm1, %v38_v24 }
  0x7f   :  { %73 = shalt.err (!%p70_p4)
}
  0x80   :  { %51 = dma.vmem_to_hbm [thread:$0]  %s49_s23, 64, %s133_s1, [#allocation3]  }
  0x81   :  { %82 = dma.done.wait [#allocation3], 64  }
  0x82   :  { %83 = vsyncadd [#allocation3], 4294967232 }
  0x83   :  { %55 = vsyncpa [#allocation3], 1 }

</bundles_post_ra>
